<compile_context>
chip_gen: v7x
topology: tpu7x:2x2x1
jax: 0.10.0
libtpu: 0.0.40
codegen_flags: <defaults>
</compile_context>

<pallas_src>
import math

import jax
import jax.numpy as jnp
from jax.experimental import pallas as pl
from jax.experimental.pallas import tpu as pltpu


def _round_up(x: int, m: int) -> int:
    return ((x + m - 1) // m) * m


# ----------------------------- Pallas kernel ------------------------------

def _gmm_nll_kernel(x_ref, w1_ref, w2_ref, cc_ref, out_ref):
    """Negative log density for one tile of samples.

    x_ref  : (TN, D)     natural-layout sample tile (contiguous HBM DMA)
    w1_ref : (K_pad, D)  -1/(2*cov)
    w2_ref : (K_pad, D)  2*mean/(2*cov)
    cc_ref : (K_pad, 1)  per-component constant (incl. scalar prior);
                         padded components hold -1e30
    out_ref: (1, TN)     negative log density per sample (lane-dense)
    """
    xt = x_ref[...].T                                        # (D, TN) small XLU transpose
    # quadratic form via two MXU matmuls accumulated in f32 (no concat buffer)
    y = jnp.dot(w1_ref[...], xt * xt,
                preferred_element_type=jnp.float32)          # (K_pad, TN)
    y = y + jnp.dot(w2_ref[...], xt,
                    preferred_element_type=jnp.float32)      # (K_pad, TN)
    y = y + cc_ref[...]                                      # bias broadcast over lanes

    # logsumexp over components (sublane axis) -> lane-dense (1, TN)
    m = jnp.max(y, axis=0, keepdims=True)                    # (1, TN)
    s = jnp.sum(jnp.exp(y - m), axis=0, keepdims=True)       # (1, TN)
    out_ref[...] = -(m + jnp.log(s))                         # (1, TN) unmasked store


# ------------------------------ parameters --------------------------------

class GaussianMixtureParams:
    """Deterministic parameter construction mirroring the PyTorch __init__."""

    def __init__(self, n_mix_comp, dim, covariance_type='diagonal',
                 mean_init=(2.0, 5.0), sd_init=(0.5, 1.0), weight_alpha=1,
                 key=None):
        assert covariance_type == 'diagonal', \
            "this kernel instantiates the default 'diagonal' case"
        self.dim = dim
        self.n_mix_comp = n_mix_comp
        self.covariance_type = covariance_type
        self.weight_alpha = weight_alpha

        # softball prior over means (used for init + prior log-prob)
        self.radius = float(mean_init[0])
        self.sharpness = float(mean_init[1])
        self._softball_norm = (math.lgamma(1 + dim * 0.5)
                               - dim * (math.log(self.radius)
                                        + 0.5 * math.log(math.pi)))

        # deterministic "softball.sample" for the means
        key = jax.random.PRNGKey(0) if key is None else key
        k1, k2 = jax.random.split(key)
        s = jax.random.normal(k1, (n_mix_comp, dim), dtype=jnp.float32)
        s = s / jnp.linalg.norm(s, axis=-1, keepdims=True)
        local_len = self.radius * jnp.power(
            jax.random.uniform(k2, (n_mix_comp, 1), dtype=jnp.float32),
            1.0 / dim)
        self.mean = s * local_len                                      # (K, D)

        # log_var (diagonal): fill with 2*log(sd_init[0])
        self._log_var_factor = 0.5
        self.log_var = jnp.full((n_mix_comp, dim),
                                2.0 * math.log(sd_init[0]),
                                dtype=jnp.float32)                     # (K, D)
        # Gaussian prior over -log_var
        self._lv_prior_mean = -2.0 * math.log(sd_init[0])
        self._lv_prior_sd = float(sd_init[1])

        # weights
        self.weight = jnp.ones((n_mix_comp,), dtype=jnp.float32)       # (K,)
        self._dirichlet_constant = (math.lgamma(n_mix_comp * weight_alpha)
                                    - n_mix_comp * math.lgamma(weight_alpha))
        self._pi_term = -0.5 * dim * math.log(2.0 * math.pi)

    def prior_log_prob(self):
        """Scalar prior log prob over mean, log_var and mixture coefficients."""
        p = jnp.float32(self._dirichlet_constant)
        if self.weight_alpha != 1:
            probs = jax.nn.softmax(self.weight, axis=-1)
            p = p + (self.weight_alpha - 1.0) * jnp.sum(jnp.log(probs))
        # softball.log_prob(mean).sum()
        norm = jnp.linalg.norm(self.mean, axis=-1)
        p = p + jnp.sum(self._softball_norm
                        - jax.nn.softplus(self.sharpness
                                          * (norm / self.radius - 1.0)))
        # Normal(mu=-2*log(sd0), sd=sd1).log_prob(-log_var).sum()
        v = -self.log_var
        lp = (-0.5 * math.log(2.0 * math.pi)
              - math.log(self._lv_prior_sd)
              - 0.5 * jnp.square((v - self._lv_prior_mean) / self._lv_prior_sd))
        p = p + jnp.sum(lp)
        return p


# ------------------------------ JAX wrapper -------------------------------

def gmm_forward(params: GaussianMixtureParams, x: jnp.ndarray,
                tile_n: int = 8192) -> jnp.ndarray:
    """Negative log density of the GMM for each row of x (shape (N, dim))."""
    n, d = x.shape
    k = params.n_mix_comp

    # sample tile: multiple of 128, >= 128, <= tile_n; ragged last block OK
    tile = min(tile_n, _round_up(n, 128))
    tile = max(128, (tile // 128) * 128)
    # keep both v7x TensorCores busy when the batch would collapse to 1 step
    if pl.cdiv(n, tile) < 2 and n > 256:
        tile = max(128, _round_up(pl.cdiv(n, 2), 128))
    num_tiles = pl.cdiv(n, tile)

    # component axis padded to the f32 sublane quantum (8), not 128
    k_pad = _round_up(k, 8)

    # fused weights: y = W1 @ (x*x)^T + W2 @ x^T + cc   with itc = 1/(2*cov)
    cov = jnp.exp(params.log_var)                                      # (K, D)
    itc = 1.0 / (2.0 * cov)                                            # (K, D)
    w1 = jnp.pad((-itc).astype(jnp.float32),
                 ((0, k_pad - k), (0, 0)))                             # (K_pad, D)
    w2 = jnp.pad((2.0 * params.mean * itc).astype(jnp.float32),
                 ((0, k_pad - k), (0, 0)))                             # (K_pad, D)

    c_k = jnp.sum(jnp.square(params.mean) * itc, axis=-1)              # (K,)
    log_softmax_w = jax.nn.log_softmax(params.weight, axis=0)          # (K,)
    prior = params.prior_log_prob()                                    # scalar
    comp_const = (-c_k
                  - params._log_var_factor * jnp.sum(params.log_var, axis=-1)
                  + params._pi_term
                  + log_softmax_w
                  + prior)                                             # (K,)
    cc = jnp.full((k_pad, 1), -1e30, dtype=jnp.float32)                # f32 sentinel
    cc = cc.at[:k, 0].set(comp_const.astype(jnp.float32))              # (K_pad, 1)

    xf = x.astype(jnp.float32)   # no transpose, no pad: contiguous row-major DMA

    out = pl.pallas_call(
        _gmm_nll_kernel,
        out_shape=jax.ShapeDtypeStruct((1, n), jnp.float32),
        grid=(num_tiles,),
        in_specs=[
            pl.BlockSpec((tile, d), lambda i: (i, 0)),      # x, natural layout
            pl.BlockSpec((k_pad, d), lambda i: (0, 0)),     # -1/(2 cov)
            pl.BlockSpec((k_pad, d), lambda i: (0, 0)),     # 2*mean/(2 cov)
            pl.BlockSpec((k_pad, 1), lambda i: (0, 0)),     # component bias
        ],
        out_specs=pl.BlockSpec((1, tile), lambda i: (0, i)),
        compiler_params=pltpu.CompilerParams(
            dimension_semantics=("parallel",),
            vmem_limit_bytes=32 * 1024 * 1024),
    )(xf, w1, w2, cc)

    return out[0]


# ---------------------------- reference (JAX) ------------------------------

def gmm_forward_ref(params: GaussianMixtureParams, x: jnp.ndarray):
    cov = jnp.exp(params.log_var)
    diff = x[:, None, :] - params.mean[None, :, :]
    y = -jnp.sum(jnp.square(diff) / (2.0 * cov), axis=-1)
    y = y - params._log_var_factor * jnp.sum(params.log_var, axis=-1)
    y = y + params._pi_term
    y = y + jax.nn.log_softmax(params.weight, axis=0)
    y = jax.scipy.special.logsumexp(y, axis=-1)
    y = y + params.prior_log_prob()
    return -y


# --------------------------------- main ------------------------------------

if __name__ == "__main__":
    key = jax.random.PRNGKey(0)
    k_param, k_x1, k_x2 = jax.random.split(key, 3)

    n_mix_comp, dim, batch = 4, 32, 8
    params = GaussianMixtureParams(n_mix_comp, dim, key=k_param)

    # small batch (single partial tile)
    x = jax.random.normal(k_x1, (batch, dim), dtype=jnp.float32)
    out = jax.block_until_ready(gmm_forward(params, x))
    ref = gmm_forward_ref(params, x)
    assert out.shape == (batch,)
    assert jnp.allclose(out, ref, rtol=1e-4, atol=1e-3), (out, ref)

    # larger batch exercising multiple grid steps + ragged last block
    n_big = 1500
    x_big = jax.random.normal(k_x2, (n_big, dim), dtype=jnp.float32)
    out_big = jax.block_until_ready(gmm_forward(params, x_big))
    ref_big = gmm_forward_ref(params, x_big)
    assert out_big.shape == (n_big,)
    assert jnp.allclose(out_big, ref_big, rtol=1e-4, atol=1e-3)

    print("KERNEL_OK")
</pallas_src>

<mosaic_0001>
module attributes {stable_mosaic.version = 11 : i64} {
  func.func @_gmm_nll_kernel(%arg0: i32, %arg1: memref<128x32xf32, #tpu.memory_space<vmem>>, %arg2: memref<8x32xf32, #tpu.memory_space<vmem>>, %arg3: memref<8x32xf32, #tpu.memory_space<vmem>>, %arg4: memref<8x1xf32, #tpu.memory_space<vmem>>, %arg5: memref<1x128xf32, #tpu.memory_space<vmem>>) attributes {dimension_semantics = [#tpu.dimension_semantics<parallel>], iteration_bounds = array<i64: 1>, scalar_prefetch = 0 : i64, scratch_operands = 0 : i64, tpu.core_type = #tpu.core_type<tc>, window_params = [{transform_indices = @transform_0, window_bounds = array<i64: 128, 32>}, {pipeline_mode = #tpu.pipeline_mode<synchronous>, transform_indices = @transform_1, window_bounds = array<i64: 8, 32>}, {pipeline_mode = #tpu.pipeline_mode<synchronous>, transform_indices = @transform_2, window_bounds = array<i64: 8, 32>}, {pipeline_mode = #tpu.pipeline_mode<synchronous>, transform_indices = @transform_3, window_bounds = array<i64: 8, 1>}, {transform_indices = @transform_4, window_bounds = array<i64: 1, 128>}]} {
    %c0 = arith.constant 0 : index
    %c0_0 = arith.constant 0 : index
    %0 = vector.load %arg1[%c0, %c0_0] : memref<128x32xf32, #tpu.memory_space<vmem>>, vector<128x32xf32>
    %1 = tpu.transpose %0, [1, 0] : vector<128x32xf32> -> vector<32x128xf32>
    %c0_1 = arith.constant 0 : index
    %c0_2 = arith.constant 0 : index
    %2 = vector.load %arg2[%c0_1, %c0_2] : memref<8x32xf32, #tpu.memory_space<vmem>>, vector<8x32xf32>
    %3 = arith.mulf %1, %1 : vector<32x128xf32>
    %cst = arith.constant dense<0.000000e+00> : vector<8x128xf32>
    %4 = tpu.matmul %2, %3, %cst {dimension_numbers = #tpu.dot_dimension_numbers<[1], [0], [0], [1], [0, 0, 1, 1], [], []>} : vector<8x32xf32>, vector<32x128xf32>, vector<8x128xf32> -> vector<8x128xf32>
    %c0_3 = arith.constant 0 : index
    %c0_4 = arith.constant 0 : index
    %5 = vector.load %arg3[%c0_3, %c0_4] : memref<8x32xf32, #tpu.memory_space<vmem>>, vector<8x32xf32>
    %cst_5 = arith.constant dense<0.000000e+00> : vector<8x128xf32>
    %6 = tpu.matmul %5, %1, %cst_5 {dimension_numbers = #tpu.dot_dimension_numbers<[1], [0], [0], [1], [0, 0, 1, 1], [], []>} : vector<8x32xf32>, vector<32x128xf32>, vector<8x128xf32> -> vector<8x128xf32>
    %7 = arith.addf %4, %6 : vector<8x128xf32>
    %c0_6 = arith.constant 0 : index
    %c0_7 = arith.constant 0 : index
    %8 = vector.load %arg4[%c0_6, %c0_7] : memref<8x1xf32, #tpu.memory_space<vmem>>, vector<8x1xf32>
    %9 = vector.broadcast %8 : vector<8x1xf32> to vector<8x128xf32>
    %10 = arith.addf %7, %9 : vector<8x128xf32>
    %cst_8 = arith.constant dense<0xFF800000> : vector<128xf32>
    %11 = vector.multi_reduction <maximumf>, %10, %cst_8 [0] : vector<8x128xf32> to vector<128xf32>
    %12 = vector.shape_cast %11 : vector<128xf32> to vector<1x128xf32>
    %13 = vector.broadcast %12 : vector<1x128xf32> to vector<8x128xf32>
    %14 = arith.subf %10, %13 : vector<8x128xf32>
    %15 = math.exp %14 : vector<8x128xf32>
    %cst_9 = arith.constant dense<0.000000e+00> : vector<128xf32>
    %16 = vector.multi_reduction <add>, %15, %cst_9 [0] : vector<8x128xf32> to vector<128xf32>
    %17 = vector.shape_cast %16 : vector<128xf32> to vector<1x128xf32>
    %18 = math.log %17 : vector<1x128xf32>
    %19 = arith.addf %12, %18 : vector<1x128xf32>
    %cst_10 = arith.constant 0.000000e+00 : f32
    %20 = vector.broadcast %cst_10 : f32 to vector<1x128xf32>
    %21 = arith.subf %20, %19 : vector<1x128xf32>
    %c0_11 = arith.constant 0 : index
    %c0_12 = arith.constant 0 : index
    %22 = vector.load %arg5[%c0_11, %c0_12] : memref<1x128xf32, #tpu.memory_space<vmem>>, vector<1x128xf32>
    tpu.vector_store %arg5[%c0_11, %c0_12], %21 {strides = array<i32>} : memref<1x128xf32, #tpu.memory_space<vmem>>, vector<1x128xf32>,
    return
  }
  func.func @transform_0(%arg0: i32) -> (i32, i32) {
    %c0_i32 = arith.constant 0 : i32
    %c0_i32_0 = arith.constant 0 : i32
    return %arg0, %c0_i32 : i32, i32
  }
  func.func @transform_1(%arg0: i32) -> (i32, i32) {
    %c0_i32 = arith.constant 0 : i32
    %c0_i32_0 = arith.constant 0 : i32
    %c0_i32_1 = arith.constant 0 : i32
    return %c0_i32, %c0_i32_0 : i32, i32
  }
  func.func @transform_2(%arg0: i32) -> (i32, i32) {
    %c0_i32 = arith.constant 0 : i32
    %c0_i32_0 = arith.constant 0 : i32
    %c0_i32_1 = arith.constant 0 : i32
    return %c0_i32, %c0_i32_0 : i32, i32
  }
  func.func @transform_3(%arg0: i32) -> (i32, i32) {
    %c0_i32 = arith.constant 0 : i32
    %c0_i32_0 = arith.constant 0 : i32
    %c0_i32_1 = arith.constant 0 : i32
    return %c0_i32, %c0_i32_0 : i32, i32
  }
  func.func @transform_4(%arg0: i32) -> (i32, i32) {
    %c0_i32 = arith.constant 0 : i32
    %c0_i32_0 = arith.constant 0 : i32
    return %c0_i32, %arg0 : i32, i32
  }
}

</mosaic_0001>

<bundles_post_ra>
// kernel: tpu_custom_call.1
= control target key start
LH: loop header
LB: loop body
LE: loop exit
PB: predicated region body
PF: predicated region fallthrough
CT: control target
= control target key end

     0   :  { %9 = vsyncpa [#allocation3], 0  ;;  %s488_s0 = inlined_call_operand.vmem [shape: f32[8,32], index: 0, kind: input, shape index: {}]   ;;  %s489_s1 = inlined_call_operand.hbm [shape: f32[8,32], index: 1, kind: input, shape index: {}]   ;;  %s490_s2 = inlined_call_operand.vmem [shape: f32[8,32], index: 2, kind: input, shape index: {}]   ;;  %s491_s3 = inlined_call_operand.vmem [shape: f32[8,1], index: 3, kind: input, shape index: {}]   ;;  %s492_s4 = inlined_call_operand.hbm [shape: f32[1,8], index: 4, kind: output, shape index: {}]  }
   0x1   :  { %10 = vsyncpa [#allocation4], 0  ;;  %s379_s15 = smov [#allocation2]   ;;  %s331_s19 = scalar_lea.hbm %s489_s1, 128 }
   0x2   :  { %s19_s16 = sshll.u32 %s379_s15, 4  ;;  %p332_p0 = scmp.ne.s32.totalorder %s489_s1, %s331_s19  ;;  %s20_s16 = int_to_ptr.vmem [resolvable:$true] %s19_s16 }
   0x3   :  { %p335_p1 = scmp.lt.u32.totalorder %s331_s19, %s489_s1 }
   0x5   :  { %p337_p2 = pnand %p335_p1, %p332_p0 }
   0x7   :  { %340 = shalt.err (!%p337_p2)
}
   0x8   :  { %s341_s24 = scalar_lea.vmem %s20_s16, 128  ;;  %p346_p4 = scmp.lt.s32.totalorder %s20_s16, %s20_s16 }
   0x9   :  { %p342_p3 = scmp.ne.s32.totalorder %s20_s16, %s341_s24  ;;  %p347_p5 = scmp.lt.s32.totalorder %s341_s24, %s341_s24 }
   0xb   :  { %p348_p6 = por %p347_p5, %p346_p4 }
   0xd   :  { %p349_p7 = pnand %p348_p6, %p342_p3 }
   0xf   :  { %352 = shalt.err (!%p349_p7)
}
  0x10   :  { %22 = dma.hbm_to_vmem [thread:$0]  %s489_s1, 128, %s20_s16, [#allocation3]  }
  0x11   :  { %375 = dma.done.wait [#allocation3], 128  }
  0x12   :  { %376 = vsyncadd [#allocation3], 4294967168  ;;  %v30_v0 = vld [vmem:[%s488_s0] sm:$0xff]  ;;  %v31_v1 = vld [vmem:[%s488_s0 + $0x8] sm:$0xff]  ;;  %v380_v3 = vmov 0.0|0.0   ;;  %vm381_vm0 = vmmov 0  }
  0x13   :  { %46 = vxpose.xlu0.b32.start [1/16] (narrow) %v30_v0, 32  ;;  %v32_v2 = vld [vmem:[%s488_s0 + $0x10] sm:$0xff]  ;;  %307 = vmatprep.subr.bf16.mxu0 %v380_v3  ;;  %v33_v4 = vld [vmem:[%s488_s0 + $0x18] sm:$0xff]  ;;  %v34_v5 = vld [vmem:[%s488_s0 + $0x20] sm:$0xff]  ;;  %v382_v7 = vmov 0.0   ;;  %v383_v10 = vmov 0  }
  0x14   :  { %313 = vmatprep.subr.bf16.mxu1 %v380_v3  ;;  %v35_v6 = vld [vmem:[%s488_s0 + $0x28] sm:$0xff]  ;;  %293 = vmatprep.mubr.msk.f32.mxu0 %vm381_vm0, %v382_v7  ;;  %v231_v8 = vld [vmem:[%s491_s3] sm:$0xff]  ;;  %v36_v9 = vld [vmem:[%s488_s0 + $0x30] sm:$0xff]  ;;  %vm84_vm1 = vcmask 261120  }
  0x15   :  { %304 = vmatprep.mubr.msk.f32.mxu1 %vm381_vm0, %v382_v7  ;;  %325 = vset.pattern.permute.xlu1 %v383_v10  ;;  %v37_v11 = vld [vmem:[%s488_s0 + $0x38] sm:$0xff]  ;;  %v38_v12 = vld [vmem:[%s488_s0 + $0x40] sm:$0xff]  ;;  %v39_v13 = vld [vmem:[%s488_s0 + $0x48] sm:$0xff] }
  0x16   :  { %234 = vperm.xlu1 %325, %v231_v8   ;;  %v40_v14 = vld [vmem:[%s488_s0 + $0x50] sm:$0xff]  ;;  %v41_v15 = vld [vmem:[%s488_s0 + $0x58] sm:$0xff]  ;;  %v42_v16 = vld [vmem:[%s488_s0 + $0x60] sm:$0xff] }
  0x17   :  { %47 = vxpose.xlu0.b32.cont [2/16] (narrow) %v31_v1, 32  ;;  %v43_v17 = vld [vmem:[%s488_s0 + $0x68] sm:$0xff]  ;;  %v44_v18 = vld [vmem:[%s488_s0 + $0x70] sm:$0xff]  ;;  %v45_v19 = vld [vmem:[%s488_s0 + $0x78] sm:$0xff] }
  0x18   :  { %v83_v32 = vld [vmem:[%s490_s2] sm:$0xff]  ;;  %s384_s2 = smov [#allocation5]  }
  0x19   :  { %v78_v33 = vld [vmem:[#allocation2] sm:$0xff]  ;;  %s264_s7 = sshll.u32 %s384_s2, 4  ;;  %s265_s7 = int_to_ptr.vmem [resolvable:$true] %s264_s7 }
  0x1a   :  { %s353_s8 = scalar_lea.vmem %s265_s7, 16  ;;  %s357_s9 = scalar_lea.vmem %s265_s7, 32 }
  0x1b   :  { %48 = vxpose.xlu0.b32.cont [3/16] (narrow) %v32_v2, 32  ;;  %p354_p8 = scmp.ne.s32.totalorder %s265_s7, %s353_s8  ;;  %p358_p9 = scmp.lt.s32.totalorder %s265_s7, %s265_s7 }
  0x1c   :  { %p359_p10 = scmp.lt.s32.totalorder %s357_s9, %s353_s8 }
  0x1e   :  { %p360_p11 = por %p359_p10, %p358_p9 }
  0x1f   :  { %49 = vxpose.xlu0.b32.cont [4/16] (narrow) %v33_v4, 32 }
  0x20   :  { %p361_p12 = pnand %p360_p11, %p354_p8 }
  0x23   :  { %50 = vxpose.xlu0.b32.cont [5/16] (narrow) %v34_v5, 32 }
  0x27   :  { %51 = vxpose.xlu0.b32.cont [6/16] (narrow) %v35_v6, 32 }
  0x2b   :  { %52 = vxpose.xlu0.b32.cont [7/16] (narrow) %v36_v9, 32 }
  0x2f   :  { %53 = vxpose.xlu0.b32.cont [8/16] (narrow) %v37_v11, 32 }
  0x33   :  { %54 = vxpose.xlu0.b32.cont [9/16] (narrow) %v38_v12, 32 }
  0x37   :  { %55 = vxpose.xlu0.b32.cont [10/16] (narrow) %v39_v13, 32 }
  0x3b   :  { %56 = vxpose.xlu0.b32.cont [11/16] (narrow) %v40_v14, 32 }
  0x3f   :  { %57 = vxpose.xlu0.b32.cont [12/16] (narrow) %v41_v15, 32 }
  0x43   :  { %58 = vxpose.xlu0.b32.cont [13/16] (narrow) %v42_v16, 32 }
  0x47   :  { %59 = vxpose.xlu0.b32.cont [14/16] (narrow) %v43_v17, 32 }
  0x4b   :  { %60 = vxpose.xlu0.b32.cont [15/16] (narrow) %v44_v18, 32 }
  0x4f   :  { %61 = vxpose.xlu0.b32.end [16/16] (narrow) %v45_v19, 32 }
  0x78   :  { %326 = vset.pattern.permute.xlu0 %v383_v10 }
  0x93   :  { %v62_v20 = vpop.trf.xlu0 }
  0x94   :  { %v79_v22 = vmul.f32 %v62_v20, %v62_v20 }
  0x95   :  { %v235_v37 = vpop.permute.xlu1 %234 }
  0x97   :  { %v63_v21 = vpop.trf.xlu0 }
  0x98   :  { %v80_v23 = vmul.f32 %v63_v21, %v63_v21  ;;  %v308_v24 = vpack.c.bf16 %v63_v21, %v62_v20 }
  0x9a   :  { %309 = vmatpush3.bf16.msra.mxu0 %v308_v24  ;;  %v314_v25 = vpack.c.bf16 %v80_v23, %v79_v22 }
  0x9b   :  { %v64_v26 = vpop.trf.xlu0  ;;  %310 = vmatprep.subr.bf16.mxu0 %v380_v3 }
  0x9c   :  { %315 = vmatpush3.bf16.msra.mxu1 %v314_v25  ;;  %v81_v28 = vmul.f32 %v64_v26, %v64_v26 }
  0x9d   :  { %316 = vmatprep.subr.bf16.mxu1 %v380_v3 }
  0x9f   :  { %v65_v27 = vpop.trf.xlu0 }
  0xa0   :  { %v82_v29 = vmul.f32 %v65_v27, %v65_v27  ;;  %v311_v30 = vpack.c.bf16 %v65_v27, %v64_v26 }
  0xa2   :  { %v317_v31 = vpack.c.bf16 %v82_v29, %v81_v28  ;;  %312 = vmatpush3.bf16.msra.mxu0 %v311_v30 }
  0xa4   :  { %318 = vmatpush3.bf16.msra.mxu1 %v317_v31 }
  0xa5   :  { %294 = vmatmul.mubr.msk.f32.vlgmr.msra.gmra.mrb[0].mxu0 %vm84_vm1, %v83_v32 }
  0xa7   :  { %305 = vmatmul.mubr.msk.f32.vlgmr.msra.gmra.mrb[0].mxu1 %vm84_vm1, %v78_v33 }
 0x178   :  { %v154_v34 = vpop.f32.mrb[0].mxu0 }
 0x179   :  { %v295_v35 = vpop.f32.mrb[1].mxu0 }
 0x17a   :  { %v227_v36 = vpop.f32.mrb[0].mxu1 }
 0x17b   :  { %v228_v38 = vadd.f32 %v227_v36, %v154_v34  ;;  %v306_v39 = vpop.f32.mrb[1].mxu1 }
 0x17d   :  { %v237_v40 = vadd.f32 %v235_v37, %v228_v38 }
 0x17f   :  { %v238_v41 = vrot.slane %v237_v40, 4 }
 0x181   :  { %v239_v42 = vmax.f32 %v237_v40, %v238_v41 }
 0x183   :  { %v240_v43 = vrot.slane %v239_v42, 2 }
 0x185   :  { %v241_v44 = vmax.f32 %v239_v42, %v240_v43 }
 0x187   :  { %v242_v45 = vrot.slane %v241_v44, 1 }
 0x189   :  { %v243_v46 = vmax.f32 %v241_v44, %v242_v45 }
 0x18b   :  { %v244_v47 = vsub.f32 %v237_v40, %v243_v46 }
 0x18d   :  { %v245_v48 = vmul.f32 1.442695, %v244_v47 }
 0x18f   :  { %327 = vpow2.f32 %v245_v48 }
 0x199   :  { %v328_v49 = vpop.eup %327 }
 0x19a   :  { %v247_v50 = vrot.slane %v328_v49, 4 }
 0x19c   :  { %v248_v51 = vadd.f32 %v328_v49, %v247_v50 }
 0x19e   :  { %v249_v52 = vrot.slane %v248_v51, 2 }
 0x1a0   :  { %v250_v53 = vadd.f32 %v249_v52, %v248_v51 }
 0x1a2   :  { %v251_v54 = vrot.slane %v250_v53, 1 }
 0x1a4   :  { %v252_v55 = vadd.f32 %v251_v54, %v250_v53 }
 0x1a6   :  { %329 = vlog2.f32 %v252_v55 }
 0x1b0   :  { %v330_v56 = vpop.eup %329 }
 0x1b1   :  { %v254_v57 = vmul.f32 0.6931472, %v330_v56 }
 0x1b3   :  { %v255_v58 = vadd.f32 %v254_v57, %v243_v46 }
 0x1b5   :  { %v256_v59 = vsub.f32 0.0, %v255_v58 }
 0x1b7   :  { %257 = vst [vmem:[#allocation5] sm:$0x1] %v256_v59 }
 0x1b8   :  { %364 = shalt.err (!%p361_p12)
}
 0x1b9   :  { %s365_s12 = scalar_lea.hbm %s492_s4, 16 }
 0x1ba   :  { %p366_p13 = scmp.ne.s32.totalorder %s492_s4, %s365_s12  ;;  %p369_p0 = scmp.lt.u32.totalorder %s365_s12, %s492_s4 }
 0x1bc   :  { %p371_p1 = pnand %p369_p0, %p366_p13 }
 0x1be   :  { %374 = shalt.err (!%p371_p1)
}
 0x1bf   :  { %267 = dma.vmem_to_hbm [thread:$0]  %s265_s7, 16, %s492_s4, [#allocation4]  }
 0x1c0   :  { %377 = dma.done.wait [#allocation4], 16  }
 0x1c1   :  { %378 = vsyncadd [#allocation4], 4294967280 }
 0x1c2   :  { %271 = vsyncpa [#allocation3], 1 }
 0x1c3   :  { %272 = vsyncpa [#allocation4], 1 }

</bundles_post_ra>
